<compile_context>
chip_gen: v5e
topology: v5e:2x2
jax: 0.10.0
libtpu: 0.0.40
codegen_flags: <defaults>
</compile_context>

<pallas_src>
import jax
import jax.numpy as jnp
from jax.experimental import pallas as pl
from jax.experimental.pallas import tpu as pltpu

H = 128          # padded (lane-dense) hidden feature width
MAX_TB = 2048    # max batch tile (rows per grid step) -- tunable


def smallnet_kernel(x_ref, w1_ref, b1_ref, w2_ref, b2_ref, w3_ref, b3_ref, o_ref):
    # Layer 1: [TB, 384]bf16 @ [384, 128]bf16 on the MXU, f32 accumulation.
    h1 = jnp.dot(x_ref[...], w1_ref[...], preferred_element_type=jnp.float32)
    h1 = jax.nn.sigmoid(h1 + b1_ref[...])                    # f32 bias + sigmoid
    # Layer 2: bf16 MXU operands (cast after the f32 sigmoid), f32 accumulation.
    h2 = jnp.dot(h1.astype(jnp.bfloat16), w2_ref[...],
                 preferred_element_type=jnp.float32)
    h2 = jax.nn.sigmoid(h2 + b2_ref[...])                    # f32 bias + sigmoid
    # Layer 3, then store only the live output columns ([TB, out_dim]).
    y = jnp.dot(h2.astype(jnp.bfloat16), w3_ref[...],
                preferred_element_type=jnp.float32) + b3_ref[...]
    o_ref[...] = y[:, : o_ref.shape[1]].astype(o_ref.dtype)


def _round_up(n, m):
    return ((n + m - 1) // m) * m


def _pad2d(a, rows, cols):
    out = jnp.zeros((rows, cols), jnp.float32)
    return out.at[: a.shape[0], : a.shape[1]].set(a)


def smallnet_forward(x, params, max_tb=MAX_TB):
    """x: [B, 352] f32. params: ((w1,b1),(w2,b2),(w3,b3)) with w as [in, out]."""
    (w1, b1), (w2, b2), (w3, b3) = params
    B, in_dim = x.shape
    out_dim = w3.shape[1]

    K_PAD = _round_up(in_dim, 128)          # 352 -> 384: lane-aligned contraction

    # --- batch tile selection ----------------------------------------------
    Bp = _round_up(max(B, 8), 8)
    if Bp >= 16:
        # At least 2 grid steps on big batches (keeps both v7x TCs busy).
        TB = min(max_tb, _round_up((Bp + 1) // 2, 8))
    else:
        TB = Bp
    Bp = _round_up(Bp, TB)

    # --- zero-pad inputs / params (exact math) ------------------------------
    x_p = jnp.zeros((Bp, K_PAD), jnp.float32).at[:B, :in_dim].set(x)
    x_p = x_p.astype(jnp.bfloat16)

    w1p = _pad2d(w1, K_PAD, H).astype(jnp.bfloat16)   # bf16 MXU operand
    b1p = _pad2d(b1, 1, H)                            # f32
    w2p = _pad2d(w2, H, H).astype(jnp.bfloat16)       # padded ROWS are zero
    b2p = _pad2d(b2, 1, H)
    w3p = _pad2d(w3, H, H).astype(jnp.bfloat16)
    b3p = _pad2d(b3, 1, H)

    grid = (Bp // TB,)
    resident = lambda i: (0, 0)   # weights/biases stay put across batch tiles

    cost = pl.CostEstimate(
        flops=2 * Bp * (K_PAD * H + H * H + H * H),
        transcendentals=2 * Bp * H,
        bytes_accessed=(Bp * K_PAD * 2                      # x (bf16)
                        + (K_PAD * H + 2 * H * H) * 2       # weights (bf16)
                        + 3 * H * 4                         # biases (f32)
                        + Bp * out_dim * 4),                # output (f32)
    )

    out = pl.pallas_call(
        smallnet_kernel,
        out_shape=jax.ShapeDtypeStruct((Bp, out_dim), jnp.float32),
        grid=grid,
        in_specs=[
            pl.BlockSpec((TB, K_PAD), lambda i: (i, 0)),    # x tile
            pl.BlockSpec((K_PAD, H), resident),             # w1
            pl.BlockSpec((1, H), resident),                 # b1
            pl.BlockSpec((H, H), resident),                 # w2
            pl.BlockSpec((1, H), resident),                 # b2
            pl.BlockSpec((H, H), resident),                 # w3
            pl.BlockSpec((1, H), resident),                 # b3
        ],
        out_specs=pl.BlockSpec((TB, out_dim), lambda i: (i, 0)),
        compiler_params=pltpu.CompilerParams(
            dimension_semantics=("parallel",),
            vmem_limit_bytes=32 * 1024 * 1024),
        cost_estimate=cost,
    )(x_p, w1p, b1p, w2p, b2p, w3p, b3p)

    return out[:B]


def init_params(key, input_size=352, output_size=1):
    """PyTorch-style Linear init U(-1/sqrt(fan_in), 1/sqrt(fan_in)).
    Weights stored as [in, out] (already transposed for x @ W)."""
    dims = [(input_size, 10), (10, 10), (10, output_size)]
    params = []
    for fan_in, fan_out in dims:
        key, kw, kb = jax.random.split(key, 3)
        bound = 1.0 / jnp.sqrt(float(fan_in))
        w = jax.random.uniform(kw, (fan_in, fan_out), jnp.float32, -bound, bound)
        b = jax.random.uniform(kb, (1, fan_out), jnp.float32, -bound, bound)
        params.append((w, b))
    return params


def smallnet_reference_f32(x, params):
    (w1, b1), (w2, b2), (w3, b3) = params
    h1 = jax.nn.sigmoid(x @ w1 + b1)
    h2 = jax.nn.sigmoid(h1 @ w2 + b2)
    return h2 @ w3 + b3


def smallnet_reference_bf16(x, params):
    """Mirrors the kernel math: bf16 MXU operands everywhere, f32 accumulation,
    f32 bias adds + sigmoids."""
    (w1, b1), (w2, b2), (w3, b3) = params
    h1 = jax.nn.sigmoid(
        jnp.dot(x.astype(jnp.bfloat16), w1.astype(jnp.bfloat16),
                preferred_element_type=jnp.float32) + b1)
    h2 = jax.nn.sigmoid(
        jnp.dot(h1.astype(jnp.bfloat16), w2.astype(jnp.bfloat16),
                preferred_element_type=jnp.float32) + b2)
    return jnp.dot(h2.astype(jnp.bfloat16), w3.astype(jnp.bfloat16),
                   preferred_element_type=jnp.float32) + b3


if __name__ == "__main__":
    key = jax.random.PRNGKey(0)
    kx, kp = jax.random.split(key)

    batch, input_size, n_classes = 8, 352, 2
    output_size = 1 if n_classes == 2 else n_classes

    x = jax.random.normal(kx, (batch, input_size), jnp.float32)
    params = init_params(kp, input_size=input_size, output_size=output_size)

    out = smallnet_forward(x, params)
    out = jax.block_until_ready(out)
    assert out.shape == (batch, output_size)

    # Tight check against a reference using identical bf16-operand math.
    ref_bf16 = smallnet_reference_bf16(x, params)
    assert jnp.allclose(out, ref_bf16, atol=1e-3, rtol=1e-3)

    # Looser check against the pure-f32 PyTorch-equivalent forward.
    ref_f32 = smallnet_reference_f32(x, params)
    assert jnp.allclose(out, ref_f32, atol=3e-2, rtol=3e-2)

    print("KERNEL_OK")
</pallas_src>

<mosaic_0001>
module attributes {stable_mosaic.version = 11 : i64} {
  func.func @smallnet_kernel(%arg0: i32, %arg1: memref<8x384xbf16, #tpu.memory_space<vmem>>, %arg2: memref<384x128xbf16, #tpu.memory_space<vmem>>, %arg3: memref<1x128xf32, #tpu.memory_space<vmem>>, %arg4: memref<128x128xbf16, #tpu.memory_space<vmem>>, %arg5: memref<1x128xf32, #tpu.memory_space<vmem>>, %arg6: memref<128x128xbf16, #tpu.memory_space<vmem>>, %arg7: memref<1x128xf32, #tpu.memory_space<vmem>>, %arg8: memref<8x1xf32, #tpu.memory_space<vmem>>) attributes {dimension_semantics = [#tpu.dimension_semantics<parallel>], iteration_bounds = array<i64: 1>, scalar_prefetch = 0 : i64, scratch_operands = 0 : i64, tpu.core_type = #tpu.core_type<tc>, window_params = [{transform_indices = @transform_0, window_bounds = array<i64: 8, 384>}, {pipeline_mode = #tpu.pipeline_mode<synchronous>, transform_indices = @transform_1, window_bounds = array<i64: 384, 128>}, {pipeline_mode = #tpu.pipeline_mode<synchronous>, transform_indices = @transform_2, window_bounds = array<i64: 1, 128>}, {pipeline_mode = #tpu.pipeline_mode<synchronous>, transform_indices = @transform_3, window_bounds = array<i64: 128, 128>}, {pipeline_mode = #tpu.pipeline_mode<synchronous>, transform_indices = @transform_4, window_bounds = array<i64: 1, 128>}, {pipeline_mode = #tpu.pipeline_mode<synchronous>, transform_indices = @transform_5, window_bounds = array<i64: 128, 128>}, {pipeline_mode = #tpu.pipeline_mode<synchronous>, transform_indices = @transform_6, window_bounds = array<i64: 1, 128>}, {transform_indices = @transform_7, window_bounds = array<i64: 8, 1>}]} {
    %c0 = arith.constant 0 : index
    %c0_0 = arith.constant 0 : index
    %0 = vector.load %arg1[%c0, %c0_0] : memref<8x384xbf16, #tpu.memory_space<vmem>>, vector<8x384xbf16>
    %c0_1 = arith.constant 0 : index
    %c0_2 = arith.constant 0 : index
    %1 = vector.load %arg2[%c0_1, %c0_2] : memref<384x128xbf16, #tpu.memory_space<vmem>>, vector<384x128xbf16>
    %cst = arith.constant dense<0.000000e+00> : vector<8x128xf32>
    %2 = tpu.matmul %0, %1, %cst {dimension_numbers = #tpu.dot_dimension_numbers<[1], [0], [0], [1], [0, 0, 1, 1], [], []>} : vector<8x384xbf16>, vector<384x128xbf16>, vector<8x128xf32> -> vector<8x128xf32>
    %c0_3 = arith.constant 0 : index
    %c0_4 = arith.constant 0 : index
    %3 = vector.load %arg3[%c0_3, %c0_4] : memref<1x128xf32, #tpu.memory_space<vmem>>, vector<1x128xf32>
    %4 = vector.broadcast %3 : vector<1x128xf32> to vector<8x128xf32>
    %5 = arith.addf %2, %4 : vector<8x128xf32>
    %6 = arith.negf %5 : vector<8x128xf32>
    %7 = math.exp %6 : vector<8x128xf32>
    %cst_5 = arith.constant 1.000000e+00 : f32
    %8 = vector.broadcast %cst_5 : f32 to vector<8x128xf32>
    %9 = arith.addf %8, %7 : vector<8x128xf32>
    %10 = arith.divf %8, %9 : vector<8x128xf32>
    %11 = arith.truncf %10 : vector<8x128xf32> to vector<8x128xbf16>
    %c0_6 = arith.constant 0 : index
    %c0_7 = arith.constant 0 : index
    %12 = vector.load %arg4[%c0_6, %c0_7] : memref<128x128xbf16, #tpu.memory_space<vmem>>, vector<128x128xbf16>
    %cst_8 = arith.constant dense<0.000000e+00> : vector<8x128xf32>
    %13 = tpu.matmul %11, %12, %cst_8 {dimension_numbers = #tpu.dot_dimension_numbers<[1], [0], [0], [1], [0, 0, 1, 1], [], []>} : vector<8x128xbf16>, vector<128x128xbf16>, vector<8x128xf32> -> vector<8x128xf32>
    %c0_9 = arith.constant 0 : index
    %c0_10 = arith.constant 0 : index
    %14 = vector.load %arg5[%c0_9, %c0_10] : memref<1x128xf32, #tpu.memory_space<vmem>>, vector<1x128xf32>
    %15 = vector.broadcast %14 : vector<1x128xf32> to vector<8x128xf32>
    %16 = arith.addf %13, %15 : vector<8x128xf32>
    %17 = arith.negf %16 : vector<8x128xf32>
    %18 = math.exp %17 : vector<8x128xf32>
    %cst_11 = arith.constant 1.000000e+00 : f32
    %19 = vector.broadcast %cst_11 : f32 to vector<8x128xf32>
    %20 = arith.addf %19, %18 : vector<8x128xf32>
    %21 = arith.divf %19, %20 : vector<8x128xf32>
    %22 = arith.truncf %21 : vector<8x128xf32> to vector<8x128xbf16>
    %c0_12 = arith.constant 0 : index
    %c0_13 = arith.constant 0 : index
    %23 = vector.load %arg6[%c0_12, %c0_13] : memref<128x128xbf16, #tpu.memory_space<vmem>>, vector<128x128xbf16>
    %cst_14 = arith.constant dense<0.000000e+00> : vector<8x128xf32>
    %24 = tpu.matmul %22, %23, %cst_14 {dimension_numbers = #tpu.dot_dimension_numbers<[1], [0], [0], [1], [0, 0, 1, 1], [], []>} : vector<8x128xbf16>, vector<128x128xbf16>, vector<8x128xf32> -> vector<8x128xf32>
    %c0_15 = arith.constant 0 : index
    %c0_16 = arith.constant 0 : index
    %25 = vector.load %arg7[%c0_15, %c0_16] : memref<1x128xf32, #tpu.memory_space<vmem>>, vector<1x128xf32>
    %26 = vector.broadcast %25 : vector<1x128xf32> to vector<8x128xf32>
    %27 = arith.addf %24, %26 : vector<8x128xf32>
    %28 = vector.extract_strided_slice %27 {offsets = [0, 0], sizes = [8, 1], strides = [1, 1]} : vector<8x128xf32> to vector<8x1xf32>
    %c0_17 = arith.constant 0 : index
    %c0_18 = arith.constant 0 : index
    %29 = vector.load %arg8[%c0_17, %c0_18] : memref<8x1xf32, #tpu.memory_space<vmem>>, vector<8x1xf32>
    tpu.vector_store %arg8[%c0_17, %c0_18], %28 {strides = array<i32>} : memref<8x1xf32, #tpu.memory_space<vmem>>, vector<8x1xf32>,
    return
  }
  func.func @transform_0(%arg0: i32) -> (i32, i32) {
    %c0_i32 = arith.constant 0 : i32
    %c0_i32_0 = arith.constant 0 : i32
    return %arg0, %c0_i32 : i32, i32
  }
  func.func @transform_1(%arg0: i32) -> (i32, i32) {
    %c0_i32 = arith.constant 0 : i32
    %c0_i32_0 = arith.constant 0 : i32
    %c0_i32_1 = arith.constant 0 : i32
    return %c0_i32, %c0_i32_0 : i32, i32
  }
  func.func @transform_2(%arg0: i32) -> (i32, i32) {
    %c0_i32 = arith.constant 0 : i32
    %c0_i32_0 = arith.constant 0 : i32
    %c0_i32_1 = arith.constant 0 : i32
    return %c0_i32, %c0_i32_0 : i32, i32
  }
  func.func @transform_3(%arg0: i32) -> (i32, i32) {
    %c0_i32 = arith.constant 0 : i32
    %c0_i32_0 = arith.constant 0 : i32
    %c0_i32_1 = arith.constant 0 : i32
    return %c0_i32, %c0_i32_0 : i32, i32
  }
  func.func @transform_4(%arg0: i32) -> (i32, i32) {
    %c0_i32 = arith.constant 0 : i32
    %c0_i32_0 = arith.constant 0 : i32
    %c0_i32_1 = arith.constant 0 : i32
    return %c0_i32, %c0_i32_0 : i32, i32
  }
  func.func @transform_5(%arg0: i32) -> (i32, i32) {
    %c0_i32 = arith.constant 0 : i32
    %c0_i32_0 = arith.constant 0 : i32
    %c0_i32_1 = arith.constant 0 : i32
    return %c0_i32, %c0_i32_0 : i32, i32
  }
  func.func @transform_6(%arg0: i32) -> (i32, i32) {
    %c0_i32 = arith.constant 0 : i32
    %c0_i32_0 = arith.constant 0 : i32
    %c0_i32_1 = arith.constant 0 : i32
    return %c0_i32, %c0_i32_0 : i32, i32
  }
  func.func @transform_7(%arg0: i32) -> (i32, i32) {
    %c0_i32 = arith.constant 0 : i32
    %c0_i32_0 = arith.constant 0 : i32
    return %arg0, %c0_i32 : i32, i32
  }
}

</mosaic_0001>

<bundles_post_ra>
// kernel: tpu_custom_call.1
= control target key start
LH: loop header
LB: loop body
LE: loop exit
PB: predicated region body
PF: predicated region fallthrough
CT: control target
= control target key end

     0   :  { %12 = vsyncpa [#allocation3], 0  ;;  %s937_s0 = inlined_call_operand.hbm [shape: bf16[8,384], index: 0, kind: input, shape index: {}]   ;;  %s938_s1 = inlined_call_operand.hbm [shape: bf16[384,128], index: 1, kind: input, shape index: {}]   ;;  %s939_s2 = inlined_call_operand.vmem [shape: f32[1,128], index: 2, kind: input, shape index: {}]   ;;  %s940_s3 = inlined_call_operand.hbm [shape: bf16[128,128], index: 3, kind: input, shape index: {}]   ;;  %s941_s4 = inlined_call_operand.vmem [shape: f32[1,128], index: 4, kind: input, shape index: {}]   ;;  %s942_s5 = inlined_call_operand.hbm [shape: bf16[128,128], index: 5, kind: input, shape index: {}]   ;;  %s943_s6 = inlined_call_operand.vmem [shape: f32[1,128], index: 6, kind: input, shape index: {}]   ;;  %s944_s7 = inlined_call_operand.vmem [shape: f32[8,1], index: 7, kind: output, shape index: {}]  }
   0x1   :  { %13 = vsyncpa [#allocation5], 0  ;;  %s30_s26 = sshll.u32 %s938_s1, 4  ;;  %s31_s26 = int_to_ptr.hbm [resolvable:$true] %s30_s26 }
   0x2   :  { %14 = vsyncpa [#allocation8], 0  ;;  %s867_s27 = smov [#allocation4]   ;;  %s20_s8 = sshll.u32 %s937_s0, 4  ;;  %s21_s8 = int_to_ptr.hbm [resolvable:$true] %s20_s8 }
   0x3   :  { %s32_s28 = sshll.u32 %s867_s27, 4  ;;  %s868_s9 = smov 64   ;;  %s33_s28 = int_to_ptr.vmem [resolvable:$true] %s32_s28 }
   0x4   :  { %s869_s10 = smov 4   ;;  %s870_s11 = smov [#allocation2]  }
   0x5   :  { %38 = dma.hbm_to_vmem [thread:$0]  %s31_s26, 3072, %s33_s28, [#allocation5], %s868_s9, %s868_s9, %s869_s10  }
   0x6   :  { %s22_s12 = sshll.u32 %s870_s11, 4  ;;  %s45_s15 = sshll.u32 %s940_s3, 4  ;;  %s23_s12 = int_to_ptr.vmem [resolvable:$true] %s22_s12  ;;  %s46_s15 = int_to_ptr.hbm [resolvable:$true] %s45_s15 }
   0x7   :  { %25 = dma.hbm_to_vmem [thread:$0]  %s21_s8, 192, %s23_s12, [#allocation3]  }
   0x8   :  { %s60_s17 = sshll.u32 %s942_s5, 4  ;;  %s871_s18 = smov [#allocation6]   ;;  %s61_s17 = int_to_ptr.hbm [resolvable:$true] %s60_s17 }
   0x9   :  { %s47_s19 = sshll.u32 %s871_s18, 4  ;;  %s872_s0 = smov [#allocation7]   ;;  %s48_s19 = int_to_ptr.vmem [resolvable:$true] %s47_s19 }
   0xa   :  { %53 = dma.hbm_to_vmem [thread:$0]  %s46_s15, 1024, %s48_s19, [#allocation5], %s868_s9, %s868_s9, %s869_s10  }
   0xb   :  { %s62_s20 = sshll.u32 %s872_s0, 4  ;;  %s63_s20 = int_to_ptr.vmem [resolvable:$true] %s62_s20 }
   0xc   :  { %68 = dma.hbm_to_vmem [thread:$0]  %s61_s17, 1024, %s63_s20, [#allocation8], %s868_s9, %s868_s9, %s869_s10  }
   0xd   :  { %861 = dma.done.wait [#allocation3], 192  }
   0xe   :  { %862 = vsyncadd [#allocation3], 4294967104 }
   0xf   :  { %863 = dma.done.wait [#allocation5], 4096  }
  0x10   :  { %864 = vsyncadd [#allocation5], 4294963200 }
  0x11   :  { %865 = dma.done.wait [#allocation8], 1024  }
  0x12   :  { %866 = vsyncadd [#allocation8], 4294966272  ;;  %v715_v0 = vld [vmem:[#allocation4 + $0x38] sm:$0xff]  ;;  %v714_v3 = vld [vmem:[#allocation4 + $0x30] sm:$0xff]  ;;  %vm537_vm8 = vcmask 7168  }
  0x13   :  { %v723_v1 = vld [vmem:[#allocation4 + $0x78] sm:$0xff]  ;;  %296 = vmatpush.bf16.msra.mxu0 %v715_v0  ;;  %v722_v4 = vld [vmem:[#allocation4 + $0x70] sm:$0xff]  ;;  %v713_v6 = vld [vmem:[#allocation4 + $0x28] sm:$0xff] }
  0x14   :  { %v731_v2 = vld [vmem:[#allocation4 + $0xb8] sm:$0xff]  ;;  %309 = vmatpush.bf16.msra.mxu1 %v723_v1  ;;  %v730_v5 = vld [vmem:[#allocation4 + $0xb0] sm:$0xff]  ;;  %v721_v7 = vld [vmem:[#allocation4 + $0x68] sm:$0xff] }
  0x15   :  { %322 = vmatpush.bf16.msra.mxu2 %v731_v2  ;;  %v729_v8 = vld [vmem:[#allocation4 + $0xa8] sm:$0xff]  ;;  %v712_v9 = vld [vmem:[#allocation4 + $0x20] sm:$0xff]  ;;  %v711_v12 = vld [vmem:[#allocation4 + $0x18] sm:$0xff] }
  0x16   :  { %v720_v10 = vld [vmem:[#allocation4 + $0x60] sm:$0xff]  ;;  %v719_v13 = vld [vmem:[#allocation4 + $0x58] sm:$0xff]  ;;  %v710_v15 = vld [vmem:[#allocation4 + $0x10] sm:$0xff] }
  0x17   :  { %297 = vmatpush.bf16.msra.mxu0 %v714_v3  ;;  %v728_v11 = vld [vmem:[#allocation4 + $0xa0] sm:$0xff]  ;;  %v727_v14 = vld [vmem:[#allocation4 + $0x98] sm:$0xff]  ;;  %v718_v16 = vld [vmem:[#allocation4 + $0x50] sm:$0xff] }
  0x18   :  { %310 = vmatpush.bf16.msra.mxu1 %v722_v4  ;;  %v726_v17 = vld [vmem:[#allocation4 + $0x90] sm:$0xff]  ;;  %v709_v18 = vld [vmem:[#allocation4 + $0x8] sm:$0xff]  ;;  %v88_v22 = vld [vmem:[#allocation2 + $0x8] sm:$0xf] }
  0x19   :  { %323 = vmatpush.bf16.msra.mxu2 %v730_v5  ;;  %v717_v19 = vld [vmem:[#allocation4 + $0x48] sm:$0xff]  ;;  %v87_v20 = vld [vmem:[#allocation2] sm:$0xff]  ;;  %v708_v25 = vld [vmem:[#allocation4] sm:$0xff]  ;;  %v145_v27 = vunpack.c.l.b16 %v88_v22 }
  0x1a   :  { %v725_v21 = vld [vmem:[#allocation4 + $0x88] sm:$0xff]  ;;  %v143_v23 = vunpack.c.l.b16 %v87_v20  ;;  %v144_v24 = vunpack.c.h.b16 %v87_v20  ;;  %v716_v26 = vld [vmem:[#allocation4 + $0x40] sm:$0xff]  ;;  %v739_v32 = vld [vmem:[#allocation6 + $0x38] sm:$0xff] }
  0x1b   :  { %298 = vmatpush.bf16.msra.mxu0 %v713_v6  ;;  %v724_v28 = vld [vmem:[#allocation4 + $0x80] sm:$0xff]  ;;  %v148_v31 = vpack.c.b16 %v145_v27, %v145_v27  ;;  %423 = vmatpush.bf16.msra.mxu3 %v739_v32  ;;  %v738_v33 = vld [vmem:[#allocation6 + $0x30] sm:$0xff]  ;;  %v737_v34 = vld [vmem:[#allocation6 + $0x28] sm:$0xff] }
  0x1c   :  { %311 = vmatpush.bf16.msra.mxu1 %v721_v7  ;;  %v146_v29 = vpack.c.b16 %v143_v23, %v143_v23  ;;  %v147_v30 = vpack.c.b16 %v144_v24, %v144_v24  ;;  %v736_v35 = vld [vmem:[#allocation6 + $0x20] sm:$0xff]  ;;  %v735_v36 = vld [vmem:[#allocation6 + $0x18] sm:$0xff]  ;;  %v734_v37 = vld [vmem:[#allocation6 + $0x10] sm:$0xff] }
  0x1d   :  { %324 = vmatpush.bf16.msra.mxu2 %v729_v8  ;;  %v754_v38 = vld [vmem:[%s939_s2] ss:$0 sm:$0xff]  ;;  %v733_v39 = vld [vmem:[#allocation6 + $0x8] sm:$0xff]  ;;  %v732_v43 = vld [vmem:[#allocation6] sm:$0xff] }
  0x1e   :  { %v747_v0 = vld [vmem:[#allocation7 + $0x38] sm:$0xff]  ;;  %v746_v1 = vld [vmem:[#allocation7 + $0x30] sm:$0xff]  ;;  %v745_v2 = vld [vmem:[#allocation7 + $0x28] sm:$0xff] }
  0x1f   :  { %299 = vmatpush.bf16.msra.mxu0 %v712_v9  ;;  %424 = vmatpush.bf16.msra.mxu3 %v738_v33  ;;  %v744_v3 = vld [vmem:[#allocation7 + $0x20] sm:$0xff]  ;;  %v743_v4 = vld [vmem:[#allocation7 + $0x18] sm:$0xff]  ;;  %v742_v5 = vld [vmem:[#allocation7 + $0x10] sm:$0xff] }
  0x20   :  { %312 = vmatpush.bf16.msra.mxu1 %v720_v10  ;;  %v741_v6 = vld [vmem:[#allocation7 + $0x8] sm:$0xff]  ;;  %v740_v7 = vld [vmem:[#allocation7] sm:$0xff]  ;;  %v755_v8 = vld [vmem:[%s941_s4] ss:$0 sm:$0xff] }
  0x21   :  { %325 = vmatpush.bf16.msra.mxu2 %v728_v11 }
  0x23   :  { %300 = vmatpush.bf16.msra.mxu0 %v711_v12  ;;  %425 = vmatpush.bf16.msra.mxu3 %v737_v34 }
  0x24   :  { %313 = vmatpush.bf16.msra.mxu1 %v719_v13 }
  0x25   :  { %326 = vmatpush.bf16.msra.mxu2 %v727_v14 }
  0x27   :  { %301 = vmatpush.bf16.msra.mxu0 %v710_v15  ;;  %426 = vmatpush.bf16.msra.mxu3 %v736_v35 }
  0x28   :  { %314 = vmatpush.bf16.msra.mxu1 %v718_v16 }
  0x29   :  { %327 = vmatpush.bf16.msra.mxu2 %v726_v17 }
  0x2b   :  { %302 = vmatpush.bf16.msra.mxu0 %v709_v18  ;;  %427 = vmatpush.bf16.msra.mxu3 %v735_v36 }
  0x2c   :  { %315 = vmatpush.bf16.msra.mxu1 %v717_v19 }
  0x2d   :  { %328 = vmatpush.bf16.msra.mxu2 %v725_v21 }
  0x2f   :  { %303 = vmatpush.bf16.msra.mxu0 %v708_v25  ;;  %428 = vmatpush.bf16.msra.mxu3 %v734_v37 }
  0x30   :  { %316 = vmatpush.bf16.msra.mxu1 %v716_v26  ;;  %v756_v26 = vld [vmem:[%s943_s6] ss:$0 sm:$0xff] }
  0x31   :  { %329 = vmatpush.bf16.msra.mxu2 %v724_v28 }
  0x32   :  { %304 = vmatmul.bf16.vlgmr.msra.gmra.mxu0 %v146_v29 }
  0x33   :  { %317 = vmatmul.bf16.vlgmr.msra.gmra.mxu1 %v147_v30  ;;  %429 = vmatpush.bf16.msra.mxu3 %v733_v39 }
  0x34   :  { %330 = vmatmul.bf16.vlgmr.msra.gmra.mxu2 %v148_v31  ;;  %524 = vmatpush.bf16.msrb.mxu0 %v747_v0 }
  0x37   :  { %430 = vmatpush.bf16.msra.mxu3 %v732_v43 }
  0x38   :  { %525 = vmatpush.bf16.msrb.mxu0 %v746_v1 }
  0x3c   :  { %526 = vmatpush.bf16.msrb.mxu0 %v745_v2 }
  0x40   :  { %527 = vmatpush.bf16.msrb.mxu0 %v744_v3 }
  0x44   :  { %528 = vmatpush.bf16.msrb.mxu0 %v743_v4 }
  0x48   :  { %529 = vmatpush.bf16.msrb.mxu0 %v742_v5 }
  0x4c   :  { %530 = vmatpush.bf16.msrb.mxu0 %v741_v6 }
  0x50   :  { %531 = vmatpush.bf16.msrb.mxu0 %v740_v7 }
  0xaf   :  { %v305_v40 = vpop.f32.mrf.mxu0 }
  0xb0   :  { %v318_v41 = vpop.f32.mrf.mxu1  ;;  %v306_v42 = vadd.f32 %v754_v38, %v305_v40 }
  0xb2   :  { %v319_v44 = vadd.f32 %v318_v41, %v306_v42 }
  0xb7   :  { %v331_v45 = vpop.f32.mrf.mxu2  ;;  %v307_v47 = vpop.f32.mrf.mxu0 }
  0xb8   :  { %v332_v46 = vadd.f32 %v331_v45, %v319_v44  ;;  %v320_v48 = vpop.f32.mrf.mxu1 }
  0xba   :  { %v642_v49 = vmul.f32 -1.442695, %v332_v46 }
  0xbc   :  { %757 = vpow2.f32 %v642_v49 }
  0xbf   :  { %v333_v50 = vpop.f32.mrf.mxu2 }
  0xc2   :  { %v758_v51 = vpop.eup %757 }
  0xc3   :  { %v338_v52 = vadd.f32 1.0, %v758_v51 }
  0xc5   :  { %759 = vrcp.f32 %v338_v52  ;;  %v350_v56 = vand.u32 2147483648, %v338_v52  ;;  %v348_v58 = vand.u32 2147483647, %v338_v52  ;;  %vm344_vm1 = vweird.f32 %v338_v52 }
  0xc7   :  { %v351_v60 = vor.u32 1.1754944e-38, %v350_v56  ;;  %vm349_vm3 = vcmp.eq.f32.partialorder %v348_v58, 8.507059e+37 }
  0xcb   :  { %v760_v53 = vpop.eup %759 }
  0xcc   :  { %v340_v54 = vmul.f32 %v760_v53, %v338_v52  ;;  %vm345_vm0 = vweird.f32 %v760_v53 }
  0xcd   :  { %vm346_vm2 = vmor %vm344_vm1, %vm345_vm0 }
  0xce   :  { %v341_v55 = vsub.f32 1.0, %v340_v54 }
  0xd0   :  { %v342_v57 = vmul.f32 %v760_v53, %v341_v55 }
  0xd2   :  { %v343_v59 = vadd.f32 %v760_v53, %v342_v57 }
  0xd4   :  { %v347_v61 = vsel %vm346_vm2, %v760_v53, %v343_v59 }
  0xd5   :  { %v352_v62 = vsel %vm349_vm3, %v351_v60, %v347_v61 }
  0xd6   :  { %v354_v63 = vpack.c.bf16 %v352_v62, %v352_v62 }
  0xd8   :  { %431 = vmatmul.bf16.vlgmr.msra.gmra.mxu3 %v354_v63 }
 0x15b   :  { %v432_v9 = vpop.f32.mrf.mxu3 }
 0x15c   :  { %v433_v10 = vadd.f32 %v755_v8, %v432_v9 }
 0x15e   :  { %v675_v11 = vmul.f32 -1.442695, %v433_v10 }
 0x160   :  { %761 = vpow2.f32 %v675_v11 }
 0x163   :  { %v434_v12 = vpop.f32.mrf.mxu3 }
 0x166   :  { %v762_v13 = vpop.eup %761 }
 0x167   :  { %v439_v14 = vadd.f32 1.0, %v762_v13 }
 0x169   :  { %763 = vrcp.f32 %v439_v14  ;;  %v451_v18 = vand.u32 2147483648, %v439_v14  ;;  %v449_v20 = vand.u32 2147483647, %v439_v14  ;;  %vm445_vm5 = vweird.f32 %v439_v14 }
 0x16b   :  { %v452_v22 = vor.u32 1.1754944e-38, %v451_v18  ;;  %vm450_vm7 = vcmp.eq.f32.partialorder %v449_v20, 8.507059e+37 }
 0x16f   :  { %v764_v15 = vpop.eup %763 }
 0x170   :  { %v441_v16 = vmul.f32 %v764_v15, %v439_v14  ;;  %vm446_vm4 = vweird.f32 %v764_v15 }
 0x171   :  { %vm447_vm6 = vmor %vm445_vm5, %vm446_vm4 }
 0x172   :  { %v442_v17 = vsub.f32 1.0, %v441_v16 }
 0x174   :  { %v443_v19 = vmul.f32 %v764_v15, %v442_v17 }
 0x176   :  { %v444_v21 = vadd.f32 %v764_v15, %v443_v19 }
 0x178   :  { %v448_v23 = vsel %vm447_vm6, %v764_v15, %v444_v21 }
 0x179   :  { %v453_v24 = vsel %vm450_vm7, %v452_v22, %v448_v23 }
 0x17a   :  { %v455_v25 = vpack.c.bf16 %v453_v24, %v453_v24 }
 0x17c   :  { %532 = vmatmul.bf16.vlgmr.msrb.gmra.mxu0 %v455_v25 }
 0x1f9   :  { %v533_v27 = vpop.f32.mrf.mxu0 }
 0x1fa   :  { %v534_v28 = vadd.f32 %v756_v26, %v533_v27 }
 0x1fc   :  { %538 = vst.msk [vmem:[%s944_s7] sm:$0xff] %vm537_vm8, %v534_v28 }
 0x201   :  { %v535_v29 = vpop.f32.mrf.mxu0 }
 0x202   :  { %543 = vsyncpa [#allocation3], 1 }
 0x203   :  { %544 = vsyncpa [#allocation5], 1 }
 0x204   :  { %545 = vsyncpa [#allocation8], 1 }

</bundles_post_ra>
